<compile_context>
chip_gen: v7x
topology: tpu7x:2x2x1
jax: 0.10.0
libtpu: 0.0.40
codegen_flags: <defaults>
</compile_context>

<pallas_src>
import functools

import jax
import jax.numpy as jnp
from jax import lax
from jax.experimental import pallas as pl
from jax.experimental.pallas import tpu as pltpu


def _transition3d_kernel(scale_ref, shift_ref, w_ref, p_ref, x_ref, o_ref, acc_ref,
                         *, cin, mm_dtype, mask_cin):
    # scale_ref/shift_ref : (cin_t, 1) f32     folded eval-mode BN affine
    # w_ref               : (Cout, cin_t)      mm_dtype, 1x1x1 conv weight * 1/8
    # p_ref               : (H*W, Ho*Wo)       mm_dtype, exact 0/1 (h, w)-pooling matrix
    # x_ref               : (1, cin_t, do_t, 2*H*W) activations, native dtype
    #                        last axis = dd*H*W + h*W + w  (depth offset dd = major half)
    # o_ref               : (1, Cout, do_t, Ho*Wo)  output, native dtype
    # acc_ref             : (Cout, do_t, H*W) f32 scratch, accumulates over Cin tiles
    cin_t = scale_ref.shape[0]
    do_t = x_ref.shape[2]
    hw = acc_ref.shape[2]

    c = pl.program_id(2)
    nc = pl.num_programs(2)

    @pl.when(c == 0)
    def _():
        acc_ref[...] = jnp.zeros_like(acc_ref)

    scale = scale_ref[...]                       # (cin_t, 1)
    shift = shift_ref[...]
    w_blk = w_ref[...]                           # (Cout, cin_t)

    if mask_cin:
        # Only emitted when the Cin tiling is ragged: zero out-of-range channels in
        # both operands so OOB garbage (possibly NaN) cannot contaminate the matmul.
        row_ok = (c * cin_t + lax.broadcasted_iota(jnp.int32, (cin_t, 1), 0)) < cin
        col_ok = (c * cin_t + lax.broadcasted_iota(jnp.int32, (1, cin_t), 1)) < cin
        w_blk = jnp.where(col_ok, w_blk, 0)

    for i in range(do_t):                        # static unroll, do_t <= 8
        xi = x_ref[0, :, i, :].astype(jnp.float32)          # (cin_t, 2*H*W)
        yi = jnp.maximum(xi * scale + shift, 0.0)           # eval BN + ReLU
        if mask_cin:
            yi = jnp.where(row_ok, yi, 0.0)
        yi = yi[:, :hw] + yi[:, hw:]                        # depth 2->1 pool (lane-half add)
        zi = jnp.dot(w_blk, yi.astype(mm_dtype),
                     preferred_element_type=jnp.float32)    # (Cout, H*W)
        acc_ref[:, i, :] += zi

    @pl.when(c == nc - 1)
    def _():
        p = p_ref[...]
        for i in range(do_t):
            oi = jnp.dot(acc_ref[:, i, :].astype(mm_dtype), p,
                         preferred_element_type=jnp.float32)   # (Cout, Ho*Wo)
            o_ref[0, :, i, :] = oi.astype(o_ref.dtype)


def _round_up(x, m):
    return -(-x // m) * m


def _vmem_caps():
    """Generation-aware (budget, vmem_limit) in bytes."""
    cap = 64 * 1024 * 1024                        # conservative fallback (works everywhere)
    try:
        info = pltpu.get_tpu_info()
        cap = int(getattr(info, "vmem_capacity_bytes", cap)) or cap
    except Exception:
        pass
    budget = (cap * 3) // 8                       # ~48 MiB (v5e/v6e), ~24 MiB (v7x)
    limit = (cap * 3) // 4                        # ~96 MiB (v5e/v6e), ~48 MiB (v7x)
    return budget, limit


def _pick_cin_tile(Cin, Cout, do_t, hw2, hw, howo, x_bytes, mm_bytes, budget):
    """Largest legal Cin tile whose padded, double-buffered footprint fits `budget`.

    Legal tiles: cin_t == Cin, or a multiple of 128 (the weight block's lane dim)."""
    cands = [Cin]
    c = (Cin // 128) * 128
    while c >= 128:
        if c < Cin:
            cands.append(c)
        c -= 128
    cands = sorted(set(cands), reverse=True)

    def footprint(cin_t):
        do_p = _round_up(do_t, 8)
        xblk = cin_t * do_p * _round_up(hw2, 128) * x_bytes * 2       # double-buffered input
        oblk = Cout * do_p * _round_up(howo, 128) * x_bytes * 2       # double-buffered output
        acc = Cout * do_p * _round_up(hw, 128) * 4                    # f32 accumulator
        pblk = _round_up(hw, 8) * _round_up(howo, 128) * mm_bytes * 2
        wblk = _round_up(Cout, 8) * _round_up(cin_t, 128) * mm_bytes * 2
        vecs = 4 * _round_up(cin_t, 8) * 128 * 4
        temps = 4 * _round_up(cin_t, 8) * _round_up(hw2, 128) * 4     # per-slice f32 working set
        return xblk + oblk + acc + pblk + wblk + vecs + temps

    for ct in cands:
        if footprint(ct) <= budget:
            return ct
    return cands[-1]


def transition3d_forward(x_ncdhw, gamma, beta, running_mean, running_var,
                         conv_w, eps=1e-5):
    """Fused eval-mode BN3d -> ReLU -> Conv3d(1x1x1, no bias) -> AvgPool3d(2,2,2).

    x_ncdhw: (N, Cin, D, H, W) in its native dtype (f32 or bf16).
    conv_w:  (Cout, Cin, 1, 1, 1).
    Returns (N, Cout, D//2, H//2, W//2) in x's dtype.
    """
    N, Cin, D, H, W = x_ncdhw.shape
    Cout = conv_w.shape[0]

    # PyTorch AvgPool3d(2, 2) floors odd spatial dims; cropping first is exactly
    # equivalent for this pointwise-in-space pipeline.
    Du, Hu, Wu = D - D % 2, H - H % 2, W - W % 2
    assert Du >= 2 and Hu >= 2 and Wu >= 2, "spatial dims must be >= 2"
    if (Du, Hu, Wu) != (D, H, W):
        x_ncdhw = x_ncdhw[:, :, :Du, :Hu, :Wu]
    Do, Ho, Wo = Du // 2, Hu // 2, Wu // 2
    HW, HW2, HoWo = Hu * Wu, 2 * Hu * Wu, Ho * Wo

    out_dtype = x_ncdhw.dtype
    # bf16 models -> bf16 MXU operands (f32 accumulation); f32 models stay exact f32.
    mm_dtype = jnp.bfloat16 if out_dtype == jnp.bfloat16 else jnp.float32
    x_bytes = jnp.dtype(out_dtype).itemsize
    mm_bytes = jnp.dtype(mm_dtype).itemsize

    # ---- host glue: ONLY free contiguous reshapes (no transposes, no dtype casts of x).
    # last axis index of x4 = dd*H*W + h*W + w  (dd = depth pool offset, major half)
    x4 = x_ncdhw.reshape(N, Cin, Do, HW2)

    # eval-mode BN folded to per-channel scale / shift (f32).
    # TODO(synk): training-mode BatchNorm (batch stats + running-stat update) not implemented.
    inv_std = 1.0 / jnp.sqrt(running_var.astype(jnp.float32) + eps)
    scale = (gamma.astype(jnp.float32) * inv_std).reshape(Cin, 1)
    shift = (beta.astype(jnp.float32)
             - running_mean.astype(jnp.float32) * gamma.astype(jnp.float32) * inv_std
             ).reshape(Cin, 1)

    # 1x1x1 conv weight with the 1/8 average-pool factor folded in (1/8 exact in bf16 too).
    wmat = (conv_w.reshape(Cout, Cin).astype(jnp.float32) * 0.125).astype(mm_dtype)

    # Exact 0/1 pooling matrix over the (h, w) plane: (H*W, Ho*Wo).
    r = jnp.arange(HW, dtype=jnp.int32)
    col = (r // Wu // 2) * Wo + (r % Wu) // 2
    pmat = (col[:, None] == jnp.arange(HoWo, dtype=jnp.int32)[None, :]).astype(mm_dtype)

    # ---- tiling (cdiv grid; second-minor block dims must be a multiple of 8 or the full dim).
    do_t = Do if Do <= 8 else 8
    budget, vmem_limit = _vmem_caps()
    cin_t = _pick_cin_tile(Cin, Cout, do_t, HW2, HW, HoWo, x_bytes, mm_bytes, budget)
    grid = (N, pl.cdiv(Do, do_t), pl.cdiv(Cin, cin_t))
    mask_cin = (Cin % cin_t) != 0

    kernel = functools.partial(_transition3d_kernel, cin=Cin,
                               mm_dtype=mm_dtype, mask_cin=mask_cin)

    flops = (2 * N * Cin * Cout * Do * HW          # 1x1x1 conv on depth-pooled activations
             + 2 * N * Cout * Do * HW * HoWo       # (h, w) pooling matmul
             + 6 * N * Cin * Du * Hu * Wu)         # BN + ReLU + depth-pool adds
    bytes_accessed = (x_bytes * N * Cin * Du * Hu * Wu
                      + x_bytes * N * Cout * Do * HoWo
                      + mm_bytes * (Cout * Cin + HW * HoWo)
                      + 4 * 2 * Cin)

    out = pl.pallas_call(
        kernel,
        out_shape=jax.ShapeDtypeStruct((N, Cout, Do, HoWo), out_dtype),
        grid_spec=pltpu.PrefetchScalarGridSpec(
            num_scalar_prefetch=0,
            grid=grid,
            in_specs=[
                pl.BlockSpec((cin_t, 1), lambda n, d, c: (c, 0)),          # BN scale
                pl.BlockSpec((cin_t, 1), lambda n, d, c: (c, 0)),          # BN shift
                pl.BlockSpec((Cout, cin_t), lambda n, d, c: (0, c)),       # conv weight * 1/8
                pl.BlockSpec((HW, HoWo), lambda n, d, c: (0, 0)),          # (h, w) pooling matrix
                pl.BlockSpec((1, cin_t, do_t, HW2), lambda n, d, c: (n, c, d, 0)),  # activations
            ],
            out_specs=pl.BlockSpec((1, Cout, do_t, HoWo), lambda n, d, c: (n, 0, d, 0)),
            scratch_shapes=[pltpu.VMEM((Cout, do_t, HW), jnp.float32)],
        ),
        compiler_params=pltpu.CompilerParams(
            dimension_semantics=("parallel", "parallel", "arbitrary"),
            vmem_limit_bytes=int(vmem_limit),
        ),
        cost_estimate=pl.CostEstimate(
            flops=flops, transcendentals=0, bytes_accessed=bytes_accessed),
    )(scale, shift, wmat, pmat, x4)

    # ---- free contiguous reshape back to the PyTorch NCDHW output layout.
    return out.reshape(N, Cout, Do, Ho, Wo)


def _reference_forward(x, gamma, beta, mean, var, conv_w, eps=1e-5):
    """Pure-JAX reference mirroring the PyTorch module (eval-mode BN), in f32."""
    Cout, Cin = conv_w.shape[0], conv_w.shape[1]
    b = lambda v: v.astype(jnp.float32)[None, :, None, None, None]
    xf = x.astype(jnp.float32)
    xn = (xf - b(mean)) / jnp.sqrt(b(var) + eps)
    xn = b(gamma) * xn + b(beta)
    xn = jnp.maximum(xn, 0.0)
    y = jnp.einsum("ncdhw,oc->nodhw", xn, conv_w.reshape(Cout, Cin).astype(jnp.float32))
    N, Co, D, H, W = y.shape
    y = y.reshape(N, Co, D // 2, 2, H // 2, 2, W // 2, 2).mean(axis=(3, 5, 7))
    return y


if __name__ == "__main__":
    # Small shapes consistent with the module: N=2, Cin=8, Cout=4, D=H=W=8.
    N, Cin, Cout, D, H, W = 2, 8, 4, 8, 8, 8

    key = jax.random.PRNGKey(0)
    kx, kg, kb, km, kv, kw = jax.random.split(key, 6)

    x = jax.random.normal(kx, (N, Cin, D, H, W), dtype=jnp.float32)
    gamma = 1.0 + 0.1 * jax.random.normal(kg, (Cin,), dtype=jnp.float32)
    beta = 0.1 * jax.random.normal(kb, (Cin,), dtype=jnp.float32)
    running_mean = 0.1 * jax.random.normal(km, (Cin,), dtype=jnp.float32)
    running_var = jnp.abs(1.0 + 0.1 * jax.random.normal(kv, (Cin,), dtype=jnp.float32))
    conv_w = jax.random.normal(kw, (Cout, Cin, 1, 1, 1), dtype=jnp.float32) * 0.2

    # --- f32 path: exact semantics, strict tolerance.
    out = transition3d_forward(x, gamma, beta, running_mean, running_var, conv_w)
    out = jax.block_until_ready(out)
    assert out.shape == (N, Cout, D // 2, H // 2, W // 2), out.shape
    ref = _reference_forward(x, gamma, beta, running_mean, running_var, conv_w)
    max_err = float(jnp.max(jnp.abs(out.astype(jnp.float32) - ref)))
    assert jnp.allclose(out.astype(jnp.float32), ref, rtol=1e-4, atol=1e-5), max_err

    # --- bf16 path: native-dtype activations / output, bf16 MXU operands (loose tolerance).
    x_bf16 = x.astype(jnp.bfloat16)
    out_bf16 = transition3d_forward(x_bf16, gamma, beta, running_mean, running_var, conv_w)
    out_bf16 = jax.block_until_ready(out_bf16)
    assert out_bf16.dtype == jnp.bfloat16
    ref_bf16 = _reference_forward(x_bf16, gamma, beta, running_mean, running_var, conv_w)
    max_err_bf16 = float(jnp.max(jnp.abs(out_bf16.astype(jnp.float32) - ref_bf16)))
    assert jnp.allclose(out_bf16.astype(jnp.float32), ref_bf16, rtol=1e-1, atol=1e-1), max_err_bf16

    print("KERNEL_OK")
</pallas_src>

<mosaic_0001>
module attributes {stable_mosaic.version = 11 : i64} {
  func.func @_transition3d_kernel(%arg0: i32, %arg1: i32, %arg2: i32, %arg3: memref<8x1xf32, #tpu.memory_space<vmem>>, %arg4: memref<8x1xf32, #tpu.memory_space<vmem>>, %arg5: memref<4x8xf32, #tpu.memory_space<vmem>>, %arg6: memref<64x16xf32, #tpu.memory_space<vmem>>, %arg7: memref<1x8x4x128xf32, #tpu.memory_space<vmem>>, %arg8: memref<1x4x4x16xf32, #tpu.memory_space<vmem>>, %arg9: memref<4x4x64xf32, #tpu.memory_space<vmem>>) attributes {dimension_semantics = [#tpu.dimension_semantics<parallel>, #tpu.dimension_semantics<parallel>, #tpu.dimension_semantics<arbitrary>], iteration_bounds = array<i64: 2, 1, 1>, scalar_prefetch = 0 : i64, scratch_operands = 1 : i64, tpu.core_type = #tpu.core_type<tc>, window_params = [{transform_indices = @transform_0, window_bounds = array<i64: 8, 1>}, {transform_indices = @transform_1, window_bounds = array<i64: 8, 1>}, {transform_indices = @transform_2, window_bounds = array<i64: 4, 8>}, {pipeline_mode = #tpu.pipeline_mode<synchronous>, transform_indices = @transform_3, window_bounds = array<i64: 64, 16>}, {transform_indices = @transform_4, window_bounds = array<i64: 1, 8, 4, 128>}, {transform_indices = @transform_5, window_bounds = array<i64: 1, 4, 4, 16>}]} {
    %c0_i32 = arith.constant 0 : i32
    %0 = arith.cmpi eq, %arg2, %c0_i32 : i32
    %1 = arith.extui %0 : i1 to i32
    %c0_i32_0 = arith.constant 0 : i32
    %2 = arith.cmpi ne, %1, %c0_i32_0 : i32
    scf.if %2 {
      %cst_52 = arith.constant 0.000000e+00 : f32
      %81 = vector.broadcast %cst_52 : f32 to vector<4x4x64xf32>
      %c0_53 = arith.constant 0 : index
      %c0_54 = arith.constant 0 : index
      %c0_55 = arith.constant 0 : index
      %82 = vector.load %arg9[%c0_53, %c0_54, %c0_55] : memref<4x4x64xf32, #tpu.memory_space<vmem>>, vector<4x4x64xf32>
      tpu.vector_store %arg9[%c0_53, %c0_54, %c0_55], %81 {strides = array<i32>} : memref<4x4x64xf32, #tpu.memory_space<vmem>>, vector<4x4x64xf32>,
    } else {
    }
    %c0 = arith.constant 0 : index
    %c0_1 = arith.constant 0 : index
    %3 = vector.load %arg3[%c0, %c0_1] : memref<8x1xf32, #tpu.memory_space<vmem>>, vector<8x1xf32>
    %c0_2 = arith.constant 0 : index
    %c0_3 = arith.constant 0 : index
    %4 = vector.load %arg4[%c0_2, %c0_3] : memref<8x1xf32, #tpu.memory_space<vmem>>, vector<8x1xf32>
    %c0_4 = arith.constant 0 : index
    %c0_5 = arith.constant 0 : index
    %5 = vector.load %arg5[%c0_4, %c0_5] : memref<4x8xf32, #tpu.memory_space<vmem>>, vector<4x8xf32>
    %c0_6 = arith.constant 0 : index
    %c0_7 = arith.constant 0 : index
    %c0_8 = arith.constant 0 : index
    %c0_9 = arith.constant 0 : index
    %6 = vector.load %arg7[%c0_6, %c0_7, %c0_8, %c0_9] : memref<1x8x4x128xf32, #tpu.memory_space<vmem>>, vector<1x8x1x128xf32>
    %7 = vector.shape_cast %6 : vector<1x8x1x128xf32> to vector<8x128xf32>
    %8 = vector.broadcast %3 : vector<8x1xf32> to vector<8x128xf32>
    %9 = arith.mulf %7, %8 : vector<8x128xf32>
    %10 = vector.broadcast %4 : vector<8x1xf32> to vector<8x128xf32>
    %11 = arith.addf %9, %10 : vector<8x128xf32>
    %cst = arith.constant 0.000000e+00 : f32
    %12 = vector.broadcast %cst : f32 to vector<8x128xf32>
    %13 = arith.maximumf %11, %12 : vector<8x128xf32>
    %14 = vector.extract_strided_slice %13 {offsets = [0, 0], sizes = [8, 64], strides = [1, 1]} : vector<8x128xf32> to vector<8x64xf32>
    %15 = vector.extract_strided_slice %13 {offsets = [0, 64], sizes = [8, 64], strides = [1, 1]} : vector<8x128xf32> to vector<8x64xf32>
    %16 = arith.addf %14, %15 : vector<8x64xf32>
    %cst_10 = arith.constant dense<0.000000e+00> : vector<4x64xf32>
    %17 = tpu.matmul %5, %16, %cst_10 {dimension_numbers = #tpu.dot_dimension_numbers<[1], [0], [0], [1], [0, 0, 1, 1], [], []>} : vector<4x8xf32>, vector<8x64xf32>, vector<4x64xf32> -> vector<4x64xf32>
    %c0_11 = arith.constant 0 : index
    %c0_12 = arith.constant 0 : index
    %c0_13 = arith.constant 0 : index
    %18 = vector.load %arg9[%c0_11, %c0_12, %c0_13] : memref<4x4x64xf32, #tpu.memory_space<vmem>>, vector<4x1x64xf32>
    %19 = vector.shape_cast %18 : vector<4x1x64xf32> to vector<4x64xf32>
    %20 = arith.addf %19, %17 : vector<4x64xf32>
    %c0_14 = arith.constant 0 : index
    %c0_15 = arith.constant 0 : index
    %c0_16 = arith.constant 0 : index
    %21 = vector.load %arg9[%c0_14, %c0_15, %c0_16] : memref<4x4x64xf32, #tpu.memory_space<vmem>>, vector<4x1x64xf32>
    %22 = vector.shape_cast %21 : vector<4x1x64xf32> to vector<4x64xf32>
    %23 = vector.shape_cast %20 : vector<4x64xf32> to vector<4x1x64xf32>
    tpu.vector_store %arg9[%c0_14, %c0_15, %c0_16], %23 {strides = array<i32>} : memref<4x4x64xf32, #tpu.memory_space<vmem>>, vector<4x1x64xf32>,
    %c0_17 = arith.constant 0 : index
    %c0_18 = arith.constant 0 : index
    %c1 = arith.constant 1 : index
    %c0_19 = arith.constant 0 : index
    %24 = vector.load %arg7[%c0_17, %c0_18, %c1, %c0_19] : memref<1x8x4x128xf32, #tpu.memory_space<vmem>>, vector<1x8x1x128xf32>
    %25 = vector.shape_cast %24 : vector<1x8x1x128xf32> to vector<8x128xf32>
    %26 = vector.broadcast %3 : vector<8x1xf32> to vector<8x128xf32>
    %27 = arith.mulf %25, %26 : vector<8x128xf32>
    %28 = vector.broadcast %4 : vector<8x1xf32> to vector<8x128xf32>
    %29 = arith.addf %27, %28 : vector<8x128xf32>
    %cst_20 = arith.constant 0.000000e+00 : f32
    %30 = vector.broadcast %cst_20 : f32 to vector<8x128xf32>
    %31 = arith.maximumf %29, %30 : vector<8x128xf32>
    %32 = vector.extract_strided_slice %31 {offsets = [0, 0], sizes = [8, 64], strides = [1, 1]} : vector<8x128xf32> to vector<8x64xf32>
    %33 = vector.extract_strided_slice %31 {offsets = [0, 64], sizes = [8, 64], strides = [1, 1]} : vector<8x128xf32> to vector<8x64xf32>
    %34 = arith.addf %32, %33 : vector<8x64xf32>
    %cst_21 = arith.constant dense<0.000000e+00> : vector<4x64xf32>
    %35 = tpu.matmul %5, %34, %cst_21 {dimension_numbers = #tpu.dot_dimension_numbers<[1], [0], [0], [1], [0, 0, 1, 1], [], []>} : vector<4x8xf32>, vector<8x64xf32>, vector<4x64xf32> -> vector<4x64xf32>
    %c0_22 = arith.constant 0 : index
    %c1_23 = arith.constant 1 : index
    %c0_24 = arith.constant 0 : index
    %36 = vector.load %arg9[%c0_22, %c1_23, %c0_24] : memref<4x4x64xf32, #tpu.memory_space<vmem>>, vector<4x1x64xf32>
    %37 = vector.shape_cast %36 : vector<4x1x64xf32> to vector<4x64xf32>
    %38 = arith.addf %37, %35 : vector<4x64xf32>
    %c0_25 = arith.constant 0 : index
    %c1_26 = arith.constant 1 : index
    %c0_27 = arith.constant 0 : index
    %39 = vector.load %arg9[%c0_25, %c1_26, %c0_27] : memref<4x4x64xf32, #tpu.memory_space<vmem>>, vector<4x1x64xf32>
    %40 = vector.shape_cast %39 : vector<4x1x64xf32> to vector<4x64xf32>
    %41 = vector.shape_cast %38 : vector<4x64xf32> to vector<4x1x64xf32>
    tpu.vector_store %arg9[%c0_25, %c1_26, %c0_27], %41 {strides = array<i32>} : memref<4x4x64xf32, #tpu.memory_space<vmem>>, vector<4x1x64xf32>,
    %c0_28 = arith.constant 0 : index
    %c0_29 = arith.constant 0 : index
    %c2 = arith.constant 2 : index
    %c0_30 = arith.constant 0 : index
    %42 = vector.load %arg7[%c0_28, %c0_29, %c2, %c0_30] : memref<1x8x4x128xf32, #tpu.memory_space<vmem>>, vector<1x8x1x128xf32>
    %43 = vector.shape_cast %42 : vector<1x8x1x128xf32> to vector<8x128xf32>
    %44 = vector.broadcast %3 : vector<8x1xf32> to vector<8x128xf32>
    %45 = arith.mulf %43, %44 : vector<8x128xf32>
    %46 = vector.broadcast %4 : vector<8x1xf32> to vector<8x128xf32>
    %47 = arith.addf %45, %46 : vector<8x128xf32>
    %cst_31 = arith.constant 0.000000e+00 : f32
    %48 = vector.broadcast %cst_31 : f32 to vector<8x128xf32>
    %49 = arith.maximumf %47, %48 : vector<8x128xf32>
    %50 = vector.extract_strided_slice %49 {offsets = [0, 0], sizes = [8, 64], strides = [1, 1]} : vector<8x128xf32> to vector<8x64xf32>
    %51 = vector.extract_strided_slice %49 {offsets = [0, 64], sizes = [8, 64], strides = [1, 1]} : vector<8x128xf32> to vector<8x64xf32>
    %52 = arith.addf %50, %51 : vector<8x64xf32>
    %cst_32 = arith.constant dense<0.000000e+00> : vector<4x64xf32>
    %53 = tpu.matmul %5, %52, %cst_32 {dimension_numbers = #tpu.dot_dimension_numbers<[1], [0], [0], [1], [0, 0, 1, 1], [], []>} : vector<4x8xf32>, vector<8x64xf32>, vector<4x64xf32> -> vector<4x64xf32>
    %c0_33 = arith.constant 0 : index
    %c2_34 = arith.constant 2 : index
    %c0_35 = arith.constant 0 : index
    %54 = vector.load %arg9[%c0_33, %c2_34, %c0_35] : memref<4x4x64xf32, #tpu.memory_space<vmem>>, vector<4x1x64xf32>
    %55 = vector.shape_cast %54 : vector<4x1x64xf32> to vector<4x64xf32>
    %56 = arith.addf %55, %53 : vector<4x64xf32>
    %c0_36 = arith.constant 0 : index
    %c2_37 = arith.constant 2 : index
    %c0_38 = arith.constant 0 : index
    %57 = vector.load %arg9[%c0_36, %c2_37, %c0_38] : memref<4x4x64xf32, #tpu.memory_space<vmem>>, vector<4x1x64xf32>
    %58 = vector.shape_cast %57 : vector<4x1x64xf32> to vector<4x64xf32>
    %59 = vector.shape_cast %56 : vector<4x64xf32> to vector<4x1x64xf32>
    tpu.vector_store %arg9[%c0_36, %c2_37, %c0_38], %59 {strides = array<i32>} : memref<4x4x64xf32, #tpu.memory_space<vmem>>, vector<4x1x64xf32>,
    %c0_39 = arith.constant 0 : index
    %c0_40 = arith.constant 0 : index
    %c3 = arith.constant 3 : index
    %c0_41 = arith.constant 0 : index
    %60 = vector.load %arg7[%c0_39, %c0_40, %c3, %c0_41] : memref<1x8x4x128xf32, #tpu.memory_space<vmem>>, vector<1x8x1x128xf32>
    %61 = vector.shape_cast %60 : vector<1x8x1x128xf32> to vector<8x128xf32>
    %62 = vector.broadcast %3 : vector<8x1xf32> to vector<8x128xf32>
    %63 = arith.mulf %61, %62 : vector<8x128xf32>
    %64 = vector.broadcast %4 : vector<8x1xf32> to vector<8x128xf32>
    %65 = arith.addf %63, %64 : vector<8x128xf32>
    %cst_42 = arith.constant 0.000000e+00 : f32
    %66 = vector.broadcast %cst_42 : f32 to vector<8x128xf32>
    %67 = arith.maximumf %65, %66 : vector<8x128xf32>
    %68 = vector.extract_strided_slice %67 {offsets = [0, 0], sizes = [8, 64], strides = [1, 1]} : vector<8x128xf32> to vector<8x64xf32>
    %69 = vector.extract_strided_slice %67 {offsets = [0, 64], sizes = [8, 64], strides = [1, 1]} : vector<8x128xf32> to vector<8x64xf32>
    %70 = arith.addf %68, %69 : vector<8x64xf32>
    %cst_43 = arith.constant dense<0.000000e+00> : vector<4x64xf32>
    %71 = tpu.matmul %5, %70, %cst_43 {dimension_numbers = #tpu.dot_dimension_numbers<[1], [0], [0], [1], [0, 0, 1, 1], [], []>} : vector<4x8xf32>, vector<8x64xf32>, vector<4x64xf32> -> vector<4x64xf32>
    %c0_44 = arith.constant 0 : index
    %c3_45 = arith.constant 3 : index
    %c0_46 = arith.constant 0 : index
    %72 = vector.load %arg9[%c0_44, %c3_45, %c0_46] : memref<4x4x64xf32, #tpu.memory_space<vmem>>, vector<4x1x64xf32>
    %73 = vector.shape_cast %72 : vector<4x1x64xf32> to vector<4x64xf32>
    %74 = arith.addf %73, %71 : vector<4x64xf32>
    %c0_47 = arith.constant 0 : index
    %c3_48 = arith.constant 3 : index
    %c0_49 = arith.constant 0 : index
    %75 = vector.load %arg9[%c0_47, %c3_48, %c0_49] : memref<4x4x64xf32, #tpu.memory_space<vmem>>, vector<4x1x64xf32>
    %76 = vector.shape_cast %75 : vector<4x1x64xf32> to vector<4x64xf32>
    %77 = vector.shape_cast %74 : vector<4x64xf32> to vector<4x1x64xf32>
    tpu.vector_store %arg9[%c0_47, %c3_48, %c0_49], %77 {strides = array<i32>} : memref<4x4x64xf32, #tpu.memory_space<vmem>>, vector<4x1x64xf32>,
    %c0_i32_50 = arith.constant 0 : i32
    %78 = arith.cmpi eq, %arg2, %c0_i32_50 : i32
    %79 = arith.extui %78 : i1 to i32
    %c0_i32_51 = arith.constant 0 : i32
    %80 = arith.cmpi ne, %79, %c0_i32_51 : i32
    scf.if %80 {
      %c0_52 = arith.constant 0 : index
      %c0_53 = arith.constant 0 : index
      %81 = vector.load %arg6[%c0_52, %c0_53] : memref<64x16xf32, #tpu.memory_space<vmem>>, vector<64x16xf32>
      %c0_54 = arith.constant 0 : index
      %c0_55 = arith.constant 0 : index
      %c0_56 = arith.constant 0 : index
      %82 = vector.load %arg9[%c0_54, %c0_55, %c0_56] : memref<4x4x64xf32, #tpu.memory_space<vmem>>, vector<4x1x64xf32>
      %83 = vector.shape_cast %82 : vector<4x1x64xf32> to vector<4x64xf32>
      %cst_57 = arith.constant dense<0.000000e+00> : vector<4x16xf32>
      %84 = tpu.matmul %83, %81, %cst_57 {dimension_numbers = #tpu.dot_dimension_numbers<[1], [0], [0], [1], [0, 0, 1, 1], [], []>} : vector<4x64xf32>, vector<64x16xf32>, vector<4x16xf32> -> vector<4x16xf32>
      %c0_58 = arith.constant 0 : index
      %c0_59 = arith.constant 0 : index
      %c0_60 = arith.constant 0 : index
      %c0_61 = arith.constant 0 : index
      %85 = vector.load %arg8[%c0_58, %c0_59, %c0_60, %c0_61] : memref<1x4x4x16xf32, #tpu.memory_space<vmem>>, vector<1x4x1x16xf32>
      %86 = vector.shape_cast %85 : vector<1x4x1x16xf32> to vector<4x16xf32>
      %87 = vector.shape_cast %84 : vector<4x16xf32> to vector<1x4x1x16xf32>
      tpu.vector_store %arg8[%c0_58, %c0_59, %c0_60, %c0_61], %87 {strides = array<i32>} : memref<1x4x4x16xf32, #tpu.memory_space<vmem>>, vector<1x4x1x16xf32>,
      %c0_62 = arith.constant 0 : index
      %c1_63 = arith.constant 1 : index
      %c0_64 = arith.constant 0 : index
      %88 = vector.load %arg9[%c0_62, %c1_63, %c0_64] : memref<4x4x64xf32, #tpu.memory_space<vmem>>, vector<4x1x64xf32>
      %89 = vector.shape_cast %88 : vector<4x1x64xf32> to vector<4x64xf32>
      %cst_65 = arith.constant dense<0.000000e+00> : vector<4x16xf32>
      %90 = tpu.matmul %89, %81, %cst_65 {dimension_numbers = #tpu.dot_dimension_numbers<[1], [0], [0], [1], [0, 0, 1, 1], [], []>} : vector<4x64xf32>, vector<64x16xf32>, vector<4x16xf32> -> vector<4x16xf32>
      %c0_66 = arith.constant 0 : index
      %c0_67 = arith.constant 0 : index
      %c1_68 = arith.constant 1 : index
      %c0_69 = arith.constant 0 : index
      %91 = vector.load %arg8[%c0_66, %c0_67, %c1_68, %c0_69] : memref<1x4x4x16xf32, #tpu.memory_space<vmem>>, vector<1x4x1x16xf32>
      %92 = vector.shape_cast %91 : vector<1x4x1x16xf32> to vector<4x16xf32>
      %93 = vector.shape_cast %90 : vector<4x16xf32> to vector<1x4x1x16xf32>
      tpu.vector_store %arg8[%c0_66, %c0_67, %c1_68, %c0_69], %93 {strides = array<i32>} : memref<1x4x4x16xf32, #tpu.memory_space<vmem>>, vector<1x4x1x16xf32>,
      %c0_70 = arith.constant 0 : index
      %c2_71 = arith.constant 2 : index
      %c0_72 = arith.constant 0 : index
      %94 = vector.load %arg9[%c0_70, %c2_71, %c0_72] : memref<4x4x64xf32, #tpu.memory_space<vmem>>, vector<4x1x64xf32>
      %95 = vector.shape_cast %94 : vector<4x1x64xf32> to vector<4x64xf32>
      %cst_73 = arith.constant dense<0.000000e+00> : vector<4x16xf32>
      %96 = tpu.matmul %95, %81, %cst_73 {dimension_numbers = #tpu.dot_dimension_numbers<[1], [0], [0], [1], [0, 0, 1, 1], [], []>} : vector<4x64xf32>, vector<64x16xf32>, vector<4x16xf32> -> vector<4x16xf32>
      %c0_74 = arith.constant 0 : index
      %c0_75 = arith.constant 0 : index
      %c2_76 = arith.constant 2 : index
      %c0_77 = arith.constant 0 : index
      %97 = vector.load %arg8[%c0_74, %c0_75, %c2_76, %c0_77] : memref<1x4x4x16xf32, #tpu.memory_space<vmem>>, vector<1x4x1x16xf32>
      %98 = vector.shape_cast %97 : vector<1x4x1x16xf32> to vector<4x16xf32>
      %99 = vector.shape_cast %96 : vector<4x16xf32> to vector<1x4x1x16xf32>
      tpu.vector_store %arg8[%c0_74, %c0_75, %c2_76, %c0_77], %99 {strides = array<i32>} : memref<1x4x4x16xf32, #tpu.memory_space<vmem>>, vector<1x4x1x16xf32>,
      %c0_78 = arith.constant 0 : index
      %c3_79 = arith.constant 3 : index
      %c0_80 = arith.constant 0 : index
      %100 = vector.load %arg9[%c0_78, %c3_79, %c0_80] : memref<4x4x64xf32, #tpu.memory_space<vmem>>, vector<4x1x64xf32>
      %101 = vector.shape_cast %100 : vector<4x1x64xf32> to vector<4x64xf32>
      %cst_81 = arith.constant dense<0.000000e+00> : vector<4x16xf32>
      %102 = tpu.matmul %101, %81, %cst_81 {dimension_numbers = #tpu.dot_dimension_numbers<[1], [0], [0], [1], [0, 0, 1, 1], [], []>} : vector<4x64xf32>, vector<64x16xf32>, vector<4x16xf32> -> vector<4x16xf32>
      %c0_82 = arith.constant 0 : index
      %c0_83 = arith.constant 0 : index
      %c3_84 = arith.constant 3 : index
      %c0_85 = arith.constant 0 : index
      %103 = vector.load %arg8[%c0_82, %c0_83, %c3_84, %c0_85] : memref<1x4x4x16xf32, #tpu.memory_space<vmem>>, vector<1x4x1x16xf32>
      %104 = vector.shape_cast %103 : vector<1x4x1x16xf32> to vector<4x16xf32>
      %105 = vector.shape_cast %102 : vector<4x16xf32> to vector<1x4x1x16xf32>
      tpu.vector_store %arg8[%c0_82, %c0_83, %c3_84, %c0_85], %105 {strides = array<i32>} : memref<1x4x4x16xf32, #tpu.memory_space<vmem>>, vector<1x4x1x16xf32>,
    } else {
    }
    return
  }
  func.func @transform_0(%arg0: i32, %arg1: i32, %arg2: i32) -> (i32, i32) {
    %c0_i32 = arith.constant 0 : i32
    %c0_i32_0 = arith.constant 0 : i32
    return %arg2, %c0_i32 : i32, i32
  }
  func.func @transform_1(%arg0: i32, %arg1: i32, %arg2: i32) -> (i32, i32) {
    %c0_i32 = arith.constant 0 : i32
    %c0_i32_0 = arith.constant 0 : i32
    return %arg2, %c0_i32 : i32, i32
  }
  func.func @transform_2(%arg0: i32, %arg1: i32, %arg2: i32) -> (i32, i32) {
    %c0_i32 = arith.constant 0 : i32
    %c0_i32_0 = arith.constant 0 : i32
    return %c0_i32, %arg2 : i32, i32
  }
  func.func @transform_3(%arg0: i32, %arg1: i32, %arg2: i32) -> (i32, i32) {
    %c0_i32 = arith.constant 0 : i32
    %c0_i32_0 = arith.constant 0 : i32
    %c0_i32_1 = arith.constant 0 : i32
    return %c0_i32, %c0_i32_0 : i32, i32
  }
  func.func @transform_4(%arg0: i32, %arg1: i32, %arg2: i32) -> (i32, i32, i32, i32) {
    %c0_i32 = arith.constant 0 : i32
    %c0_i32_0 = arith.constant 0 : i32
    return %arg0, %arg2, %arg1, %c0_i32 : i32, i32, i32, i32
  }
  func.func @transform_5(%arg0: i32, %arg1: i32, %arg2: i32) -> (i32, i32, i32, i32) {
    %c0_i32 = arith.constant 0 : i32
    %c0_i32_0 = arith.constant 0 : i32
    %c0_i32_1 = arith.constant 0 : i32
    return %arg0, %c0_i32, %arg1, %c0_i32_0 : i32, i32, i32, i32
  }
}

</mosaic_0001>

<bundles_post_ra>
// kernel: tpu_custom_call.1
= control target key start
LH: loop header
LB: loop body
LE: loop exit
PB: predicated region body
PF: predicated region fallthrough
CT: control target
= control target key end

     0   :  { %10 = vsyncpa [#allocation4], 0  ;;  %s2881_s0 = inlined_call_operand.vmem [shape: f32[8,1], index: 0, kind: input, shape index: {}]   ;;  %s2882_s1 = inlined_call_operand.vmem [shape: f32[8,1], index: 1, kind: input, shape index: {}]   ;;  %s2883_s2 = inlined_call_operand.vmem [shape: f32[4,8], index: 2, kind: input, shape index: {}]   ;;  %s2884_s3 = inlined_call_operand.vmem [shape: f32[64,16], index: 3, kind: input, shape index: {}]   ;;  %s2885_s4 = inlined_call_operand.vmem [shape: f32[2,8,4,128], index: 4, kind: input, shape index: {}]   ;;  %s2886_s5 = inlined_call_operand.hbm [shape: f32[2,4,4,16], index: 5, kind: output, shape index: {}]  }
   0x1   :  { %12 = vsyncpa [#allocation4 + $0x1], 0  ;;  %s2152_s18 = smov 0   ;;  %s2154_s19 = smov 0  }
   0x2   :  { %s2156_s20 = smov 0   ;;  %s2158_s21 = smov 0  }
   0x3   :  { %s2160_s22 = smov 0   ;;  %s2162_s23 = smov 0  }
   0x4 LB: > { %s1757_s24 = sadd.s32 4294967295, %s2112_s23   ;;  %s1758_s25 = sadd.s32 4294967294, %s2112_s23   ;;  %s2112_s23 = sphi %s2162_s23, %s18_s23   ;;  %s2108_s22 = sphi %s2160_s22, %s2938_s22   ;;  %s2104_s21 = sphi %s2158_s21, %s2937_s21   ;;  %s2100_s20 = sphi %s2156_s20, %s2936_s20   ;;  %s2096_s19 = sphi %s2154_s19, %s2935_s19   ;;  %s2092_s18 = sphi %s2152_s18, %s2934_s18  }
   0x5   : > { %s37_s26 = sadd.s32 1, %s2108_s22  ;;  %s175_s27 = sadd.s32 1, %s2100_s20 }
   0x6   : > { %p39_p0 = scmp.ge.s32.totalorder %s37_s26, 2  ;;  %p185_p1 = scmp.ne.s32.totalorder %s2100_s20, %s2096_s19 }
   0x7   : > { %p186_p2 = scmp.eq.s32.totalorder %s1757_s24, 1  ;;  %p191_p3 = scmp.ne.s32.totalorder %s2096_s19, %s2092_s18 }
   0x8   : > { %s2940_s26 = smov (%p39_p0, %s37_s26), 0  ;;  %p192_p5 = scmp.eq.s32.totalorder %s1758_s25, 1 }
   0x9   : > { %p2192_p4 = por %p186_p2, %p185_p1  ;;  %s170_s29 = ssub.s32 %s2108_s22, %s2940_s26 }
   0xa   : > { %p1764_p6 = scmp.ge.s32.totalorder %s2112_s23, 1  ;;  %p173_p7 = scmp.eq.s32.totalorder %s170_s29, 0 }
   0xb   : > { %p2199_p8 = por %p192_p5, %p191_p3  ;;  %p250_p9 = scmp.lt.s32.totalorder %s2112_s23, 3 }
   0xc   : > { %s2205_s6 = scalar_select %p173_p7, %s2100_s20, %s175_s27  }
   0xd   : > { %p251_p10 = pnand %p1764_p6, %p250_p9 }
   0xe   : > { %v331_v0 = vld [vmem:[%s2881_s0] sm:$0xff] (!%p251_p10)  ;;  %v2114_v1 = vmov (!%p251_p10), 0   ;;  %p310_p11 = scmp.lt.s32.totalorder (!%p251_p10), %s2104_s21, 1  ;;  %s2115_s16 = smov (!%p251_p10), 64   ;;  %vm2117_vm0 = vmmov (!%p251_p10), 0   ;;  %vm326_vm1 = vcmask (!%p251_p10), 519168  }
   0xf   : > { %254 = sbr.rel (%p251_p10) target bundleno = 803 (0x323), region = 40  ;;  %2033 = vset.pattern.permute.xlu0 (!%p251_p10), %v2114_v1  ;;  %v332_v2 = vld [vmem:[%s2882_s1] sm:$0xff] (!%p251_p10)  ;;  %vm453_vm2 = vcmask (!%p251_p10), 1041409   ;;  %vm456_vm3 = vcmask (!%p251_p10), 1042434   ;;  %vm459_vm4 = vcmask (!%p251_p10), 1043459   ;;  %vm462_vm5 = vcmask (!%p251_p10), 1044484  }
  0x10   : > { %344 = vperm.xlu0 (!%p251_p10), %2033, %v331_v0   ;;  %vm465_vm6 = vcmask (!%p251_p10), 1045509   ;;  %vm468_vm7 = vcmask (!%p251_p10), 1046534   ;;  %vm471_vm8 = vcmask (!%p251_p10), 1047559   ;;  %vm474_vm9 = vcmask (!%p251_p10), 64512   ;;  %s294_s29 = sand.u32 (!%p251_p10), 1, %s2096_s19   ;;  %s1782_s9 = sshll.u32 (!%p251_p10), %s2104_s21, 8 }
  0x11   : > { %vm564_vm10 = vcmask (!%p251_p10), 516096   ;;  %vm1149_vm11 = vcmask (!%p251_p10), 523264   ;;  %s1765_s7 = sshll.u32 (!%p251_p10), %s294_s29, 4  ;;  %vm1251_vm12 = vcmask (!%p251_p10), 122880   ;;  %s2821_s13 = scalar_lea.hbm (!%p251_p10), %s2886_s5, %s1782_s9 }
  0x12   : > { %s2788_s8 = scalar_lea.vmem (!%p251_p10), [#allocation3], %s1765_s7 }
  0x13   : > { %s1628_s10 = sshll.u32 (!%p251_p10), %s2788_s8, 4  ;;  %s2827_s10 = int_to_ptr.vmem [resolvable:$true] %s1628_s10 }
  0x14   : > { %371 = vperm.xlu0 (!%p251_p10), %2033, %v332_v2   ;;  %s2034_s14 = scalar_lea.vmem (!%p251_p10), %s2827_s10, 256 }
  0x15   : > { %p2035_p12 = scmp.ne.s32.totalorder (!%p251_p10), %s2827_s10, %s2034_s14 }
  0x16   : > { %s311_s11 = scalar_select %p310_p11, %s2104_s21, 1 }
  0x17   : > { %s2833_s21 = scalar_lea.sflag [#allocation4], %s294_s29  ;;  %p2036_p13 = pnand %p2035_p12, %p2192_p4 }
  0x18   : > { %s1781_s12 = sshll.u32 %s311_s11, 5 }
  0x19   : > { %s2218_s15 = scalar_lea.vmem %s2885_s4, %s1781_s12  ;;  %p2037_p0 = pneg %p2036_p13 }
  0x1a   : > { %v334_v4 = vld [vmem:[%s2218_s15] sm:$0x1]  ;;  %v335_v6 = vld [vmem:[%s2218_s15 + $0x4] sm:$0x1]  ;;  %v569_v7 = vld [vmem:[%s2218_s15 + $0x1] sm:$0x1] }
  0x1b   : > { %v570_v10 = vld [vmem:[%s2218_s15 + $0x5] sm:$0x1]  ;;  %v754_v15 = vld [vmem:[%s2218_s15 + $0x2] sm:$0x1]  ;;  %v571_v21 = vld [vmem:[%s2218_s15 + $0x9] sm:$0x1] }
  0x1c   : > { %v939_v26 = vld [vmem:[%s2218_s15 + $0x3] sm:$0x1]  ;;  %v337_v31 = vld [vmem:[%s2218_s15 + $0xc] sm:$0x1]  ;;  %v336_v36 = vld [vmem:[%s2218_s15 + $0x8] sm:$0x1] }
  0x1d   : > { %v572_v40 = vld [vmem:[%s2218_s15 + $0xd] sm:$0x1]  ;;  %v338_v45 = vld [vmem:[%s2218_s15 + $0x10] sm:$0x1]  ;;  %v573_v50 = vld [vmem:[%s2218_s15 + $0x11] sm:$0x1] }
  0x1e   : > { %v339_v55 = vld [vmem:[%s2218_s15 + $0x14] sm:$0x1]  ;;  %v574_v60 = vld [vmem:[%s2218_s15 + $0x15] sm:$0x1]  ;;  %v340_v1 = vld [vmem:[%s2218_s15 + $0x18] sm:$0x1] }
  0x8f   : > { %v2220_v3 = vpop.permute.xlu0 %344 }
  0x90   : > { %v2224_v5 = vrot.slane %v2220_v3, 1  ;;  %v361_v8 = vmul.f32 %v2220_v3, %v334_v4  ;;  %v577_v14 = vmul.f32 %v569_v7, %v2220_v3  ;;  %v2242_v16 = vrot.slane %v2220_v3, 2 }
  0x91   : > { %v762_v24 = vmul.f32 %v754_v15, %v2220_v3  ;;  %v2274_v30 = vrot.slane %v2220_v3, 3  ;;  %v947_v34 = vmul.f32 %v939_v26, %v2220_v3  ;;  %v2307_v44 = vrot.slane %v2220_v3, 4 }
  0x92   : > { %v362_v12 = vmul.f32 %v2224_v5, %v335_v6  ;;  %v578_v20 = vmul.f32 %v570_v10, %v2224_v5  ;;  %v579_v29 = vmul.f32 %v571_v21, %v2242_v16  ;;  %v363_v43 = vmul.f32 %v2242_v16, %v336_v36 }
  0x93   : > { %v2229_v9 = vpop.permute.xlu0 %371  ;;  %v364_v39 = vmul.f32 %v2274_v30, %v337_v31  ;;  %v580_v48 = vmul.f32 %v572_v40, %v2274_v30  ;;  %v365_v53 = vmul.f32 %v2307_v44, %v338_v45  ;;  %v2331_v54 = vrot.slane %v2220_v3, 5  ;;  %v576_v31 = vld [vmem:[%s2218_s15 + $0x1d] sm:$0x1]  ;;  %v940_v45 = vld [vmem:[%s2218_s15 + $0x7] sm:$0x1] }
  0x94   : > { %v2233_v11 = vadd.f32 %v2229_v9, %v361_v8  ;;  %v2237_v13 = vrot.slane %v2229_v9, 1  ;;  %v2249_v19 = vadd.f32 %v577_v14, %v2229_v9  ;;  %v2262_v25 = vrot.slane %v2229_v9, 2  ;;  %v575_v8 = vld [vmem:[%s2218_s15 + $0x19] sm:$0x1] }
  0x95   : > { %v2270_v28 = vadd.f32 %v762_v24, %v2229_v9  ;;  %v2286_v35 = vrot.slane %v2229_v9, 3  ;;  %v2294_v38 = vadd.f32 %v947_v34, %v2229_v9  ;;  %v2319_v49 = vrot.slane %v2229_v9, 4 }
  0x96   : > { %v396_v17 = vmax.f32 %v2233_v11, 0.0  ;;  %v2246_v18 = vadd.f32 %v2237_v13, %v362_v12  ;;  %v2258_v23 = vadd.f32 %v578_v20, %v2237_v13  ;;  %v2908_v27 = vmax.f32 %v2249_v19, 0.0  ;;  %v341_v20 = vld [vmem:[%s2218_s15 + $0x1c] sm:$0x1] }
  0x97   : > { %v2282_v33 = vadd.f32 %v579_v29, %v2262_v25  ;;  %v2890_v37 = vmax.f32 %v2270_v28, 0.0  ;;  %v2303_v42 = vadd.f32 %v2286_v35, %v364_v39  ;;  %v2887_v46 = vmax.f32 %v2294_v38, 0.0  ;;  %v755_v39 = vld [vmem:[%s2218_s15 + $0x6] sm:$0x1] }
  0x98   : > { %412 = vrot.lane.b32.xlu0 %v396_v17, %s2115_s16  ;;  %v397_v22 = vmax.f32 %v2246_v18, 0.0  ;;  %v594_v32 = vmax.f32 %v2258_v23, 0.0  ;;  %v2315_v47 = vadd.f32 %v2262_v25, %v363_v43  ;;  %v2327_v52 = vadd.f32 %v580_v48, %v2286_v35 }
  0x99   : > { %v595_v41 = vmax.f32 %v2282_v33, 0.0  ;;  %v399_v51 = vmax.f32 %v2303_v42, 0.0  ;;  %v2339_v57 = vadd.f32 %v2319_v49, %v365_v53  ;;  %v581_v58 = vmul.f32 %v573_v50, %v2307_v44 }
  0x9a   : > { %414 = vrot.lane.b32.xlu1 %v397_v22, %s2115_s16  ;;  %v398_v56 = vmax.f32 %v2315_v47, 0.0  ;;  %v2343_v59 = vrot.slane %v2229_v9, 5  ;;  %v596_v61 = vmax.f32 %v2327_v52, 0.0  ;;  %v366_v63 = vmul.f32 %v2331_v54, %v339_v55 }
  0x9b   : > { %v2351_v62 = vadd.f32 %v581_v58, %v2319_v49  ;;  %v2355_v0 = vrot.slane %v2220_v3, 6  ;;  %v400_v2 = vmax.f32 %v2339_v57, 0.0  ;;  %v582_v6 = vmul.f32 %v574_v60, %v2331_v54  ;;  %v756_v58 = vld [vmem:[%s2218_s15 + $0xa] sm:$0x1] }
  0x9c   : > { %609 = vrot.lane.b32.xlu0 %v2908_v27, %s2115_s16  ;;  %v2363_v4 = vadd.f32 %v2343_v59, %v366_v63  ;;  %v2367_v7 = vrot.slane %v2229_v9, 6  ;;  %v2379_v15 = vrot.slane %v2220_v3, 7  ;;  %v2391_v29 = vrot.slane %v2229_v9, 7 }
  0x9d   : > { %v597_v10 = vmax.f32 %v2351_v62, 0.0  ;;  %v2375_v12 = vadd.f32 %v582_v6, %v2343_v59  ;;  %v367_v14 = vmul.f32 %v2355_v0, %v340_v1  ;;  %v583_v26 = vmul.f32 %v575_v8, %v2355_v0  ;;  %v941_v6 = vld [vmem:[%s2218_s15 + $0xb] sm:$0x1] }
  0x9e   : > { %611 = vrot.lane.b32.xlu1 %v594_v32, %s2115_s16  ;;  %v401_v21 = vmax.f32 %v2363_v4, 0.0  ;;  %v368_v36 = vmul.f32 %v2379_v15, %v341_v20  ;;  %v584_v43 = vmul.f32 %v576_v31, %v2379_v15  ;;  %v763_v53 = vmul.f32 %v755_v39, %v2224_v5  ;;  %v757_v39 = vld [vmem:[%s2218_s15 + $0xe] sm:$0x1] }
  0x9f   : > { %v2387_v24 = vadd.f32 %v2367_v7, %v367_v14  ;;  %v598_v3 = vmax.f32 %v2375_v12, 0.0  ;;  %v2399_v34 = vadd.f32 %v583_v26, %v2367_v7  ;;  %v2903_v55 = vmov 0.0   ;;  %v758_v26 = vld [vmem:[%s2218_s15 + $0x12] sm:$0x1] }
  0xa0   : > { %794 = vrot.lane.b32.xlu0 %v2890_v37, %s2115_s16  ;;  %v2408_v40 = vadd.f32 %v2391_v29, %v368_v36  ;;  %v2417_v50 = vadd.f32 %v584_v43, %v2391_v29  ;;  %1827 = vmatprep.subr.mxu0 %v2903_v55  ;;  %v2428_v63 = vadd.f32 %v763_v53, %v2237_v13  ;;  %v759_v53 = vld [vmem:[%s2218_s15 + $0x16] sm:$0x1]  ;;  %v761_v37 = vld [vmem:[%s2218_s15 + $0x1e] sm:$0x1]  ;;  %v2913_v52 = vmax.f32 %v2249_v19, 0.0 }
  0xa1   : > { %v2909_v9 = vmax.f32 %v2387_v24, 0.0  ;;  %v2907_v48 = vmax.f32 %v2399_v34, 0.0  ;;  %1832 = vmatprep.subr.mxu1 %v2903_v55  ;;  %v948_v1 = vmul.f32 %v940_v45, %v2224_v5  ;;  %v764_v20 = vmul.f32 %v756_v58, %v2242_v16  ;;  %1829 = vmatprep.mubr.msk.f32.mxu0 %vm2117_vm0, %v2903_v55  ;;  %327 = vst.msk [vmem:[#allocation2] sm:$0xf] %vm326_vm1, %v2903_v55 }
  0xa2   : > { %613 = vrot.lane.b32.xlu1 %v595_v41, %s2115_s16  ;;  %v2906_v60 = vmax.f32 %v2408_v40, 0.0  ;;  %v2905_v8 = vmax.f32 %v2417_v50, 0.0  ;;  %v2902_v5 = vmax.f32 %v2428_v63, 0.0  ;;  %v949_v36 = vmul.f32 %v941_v6, %v2242_v16  ;;  %v942_v6 = vld [vmem:[%s2218_s15 + $0xf] sm:$0x1]  ;;  %1834 = vmatprep.mubr.msk.f32.mxu1 %vm2117_vm0, %v2903_v55 }
  0xa3   : > { %v2437_v14 = vadd.f32 %v948_v1, %v2237_v13  ;;  %v2446_v31 = vadd.f32 %v764_v20, %v2262_v25  ;;  %v766_v45 = vmul.f32 %v758_v26, %v2307_v44  ;;  %v765_v1 = vmul.f32 %v757_v39, %v2274_v30  ;;  %328 = vst.msk [vmem:[#allocation2 + $0x4] sm:$0xf] %vm326_vm1, %v2903_v55 }
  0xa4   : > { %979 = vrot.lane.b32.xlu0 %v2887_v46, %s2115_s16  ;;  %v2455_v43 = vadd.f32 %v949_v36, %v2262_v25  ;;  %v767_v26 = vmul.f32 %v759_v53, %v2331_v54  ;;  %v760_v36 = vld [vmem:[%s2218_s15 + $0x1a] sm:$0x1]  ;;  %v950_v46 = vmul.f32 %v942_v6, %v2274_v30  ;;  %329 = vst.msk [vmem:[#allocation2 + $0x8] sm:$0xf] %vm326_vm1, %v2903_v55  ;;  %330 = vst.msk [vmem:[#allocation2 + $0xc] sm:$0xf] %vm326_vm1, %v2903_v55 }
  0xa5   : > { %v2888_v13 = vmax.f32 %v2437_v14, 0.0  ;;  %v2900_v16 = vmax.f32 %v2446_v31, 0.0  ;;  %v2464_v58 = vadd.f32 %v766_v45, %v2319_v49  ;;  %v2473_v20 = vadd.f32 %v765_v1, %v2286_v35 }
  0xa6   : > { %418 = vrot.lane.b32.xlu1 %v399_v51, %s2115_s16  ;;  %v2889_v25 = vmax.f32 %v2455_v43, 0.0  ;;  %v2482_v45 = vadd.f32 %v767_v26, %v2343_v59  ;;  %v2491_v1 = vadd.f32 %v950_v46, %v2286_v35  ;;  %v944_v35 = vld [vmem:[%s2218_s15 + $0x17] sm:$0x1]  ;;  %v2912_v42 = vmax.f32 %v2387_v24, 0.0 }
  0xa7   : > { %v2891_v39 = vmax.f32 %v2464_v58, 0.0  ;;  %v2892_v53 = vmax.f32 %v2473_v20, 0.0 }
  0xa8   : > { %416 = vrot.lane.b32.xlu0 %v398_v56, %s2115_s16  ;;  %v2898_v30 = vmax.f32 %v2482_v45, 0.0  ;;  %v2893_v46 = vmax.f32 %v2491_v1, 0.0 }
  0xaa   : > { %615 = vrot.lane.b32.xlu1 %v596_v61, %s2115_s16 }
  0xac   : > { %420 = vrot.lane.b32.xlu0 %v400_v2, %s2115_s16 }
  0xae   : > { %617 = vrot.lane.b32.xlu1 %v597_v10, %s2115_s16 }
  0xb0   : > { %422 = vrot.lane.b32.xlu0 %v401_v21, %s2115_s16 }
  0xb2   : > { %619 = vrot.lane.b32.xlu1 %v598_v3, %s2115_s16 }
  0xb4   : > { %424 = vrot.lane.b32.xlu0 %v2909_v9, %s2115_s16 }
  0xb6   : > { %621 = vrot.lane.b32.xlu1 %v2907_v48, %s2115_s16 }
  0xb8   : > { %426 = vrot.lane.b32.xlu0 %v2906_v60, %s2115_s16 }
  0xba   : > { %623 = vrot.lane.b32.xlu1 %v2905_v8, %s2115_s16 }
  0xbc   : > { %796 = vrot.lane.b32.xlu0 %v2902_v5, %s2115_s16 }
  0xbe   : > { %981 = vrot.lane.b32.xlu1 %v2888_v13, %s2115_s16  ;;  %v943_v13 = vld [vmem:[%s2218_s15 + $0x13] sm:$0x1] }
  0xbf   : > { %v951_v26 = vmul.f32 %v943_v13, %v2307_v44  ;;  %v769_v44 = vmul.f32 %v761_v37, %v2379_v15 }
  0xc0   : > { %798 = vrot.lane.b32.xlu0 %v2900_v16, %s2115_s16 }
  0xc2   : > { %983 = vrot.lane.b32.xlu1 %v2889_v25, %s2115_s16  ;;  %v768_v25 = vmul.f32 %v760_v36, %v2355_v0  ;;  %v2521_v36 = vadd.f32 %v769_v44, %v2391_v29 }
  0xc4   : > { %802 = vrot.lane.b32.xlu0 %v2891_v39, %s2115_s16  ;;  %v2500_v6 = vadd.f32 %v768_v25, %v2367_v7  ;;  %v2513_v25 = vadd.f32 %v951_v26, %v2319_v49  ;;  %v952_v39 = vmul.f32 %v944_v35, %v2331_v54  ;;  %v2896_v26 = vmax.f32 %v2521_v36, 0.0 }
  0xc6   : > { %800 = vrot.lane.b32.xlu1 %v2892_v53, %s2115_s16  ;;  %v2897_v13 = vmax.f32 %v2500_v6, 0.0  ;;  %v945_v53 = vld [vmem:[%s2218_s15 + $0x1b] sm:$0x1]  ;;  %v2895_v49 = vmax.f32 %v2513_v25, 0.0  ;;  %v2530_v37 = vadd.f32 %v952_v39, %v2343_v59 }
  0xc7   : > { %v953_v44 = vmul.f32 %v945_v53, %v2355_v0 }
  0xc8   : > { %804 = vrot.lane.b32.xlu0 %v2898_v30, %s2115_s16  ;;  %v2894_v54 = vmax.f32 %v2530_v37, 0.0 }
  0xc9   : > { %v2543_v35 = vadd.f32 %v953_v44, %v2367_v7 }
  0xca   : > { %985 = vrot.lane.b32.xlu1 %v2893_v46, %s2115_s16  ;;  %v946_v46 = vld [vmem:[%s2218_s15 + $0x1f] sm:$0x1]  ;;  %s2120_s15 = smov [#allocation3]  }
  0xcb   : > { %v954_v59 = vmul.f32 %v946_v46, %v2379_v15  ;;  %v2899_v39 = vmax.f32 %v2543_v35, 0.0  ;;  %s2038_s17 = sshll.u32 %s2120_s15, 4  ;;  %s2039_s17 = int_to_ptr.vmem [resolvable:$false] %s2038_s17 }
  0xcc   : > { %806 = vrot.lane.b32.xlu0 %v2897_v13, %s2115_s16  ;;  %s2040_s24 = scalar_lea.vmem %s2039_s17, 512  ;;  %p2041_p1 = scmp.lt.s32.totalorder %s2827_s10, %s2039_s17 }
  0xcd   : > { %v2551_v0 = vadd.f32 %v954_v59, %v2391_v29  ;;  %p2042_p2 = scmp.lt.s32.totalorder %s2040_s24, %s2034_s14 }
  0xce   : > { %987 = vrot.lane.b32.xlu1 %v2895_v49, %s2115_s16 }
  0xcf   : > { %v2901_v7 = vmax.f32 %v2551_v0, 0.0  ;;  %p2043_p3 = por %p2042_p2, %p2041_p1 }
  0xd0   : > { %808 = vrot.lane.b32.xlu0 %v2896_v26, %s2115_s16 }
  0xd1   : > { %p2044_p5 = pnand %p2043_p3, %p2037_p0 }
  0xd2   : > { %989 = vrot.lane.b32.xlu1 %v2894_v54, %s2115_s16 }
  0xd6   : > { %991 = vrot.lane.b32.xlu1 %v2899_v39, %s2115_s16 }
  0xda   : > { %993 = vrot.lane.b32.xlu1 %v2901_v7, %s2115_s16 }
 0x10a   : > { %v413_v15 = vpop.permute.xlu0 %412 }
 0x10b   : > { %v436_v18 = vadd.f32 %v413_v15, %v396_v17 }
 0x10c   : > { %v415_v29 = vpop.permute.xlu1 %414 }
 0x10d   : > { %v437_v39 = vadd.f32 %v415_v29, %v397_v22 }
 0x10e   : > { %v610_v53 = vpop.permute.xlu0 %609 }
 0x10f   : > { %v452_v55 = vrot.slane %v437_v39, 7 }
 0x110   : > { %v612_v46 = vpop.permute.xlu1 %611 }
 0x111   : > { %v634_v8 = vadd.f32 %v612_v46, %v594_v32 }
 0x112   : > { %v2564_v44 = vpop.permute.xlu0 %794 }
 0x113   : > { %v649_v11 = vrot.slane %v634_v8, 7 }
 0x114   : > { %v614_v59 = vpop.permute.xlu1 %613 }
 0x115   : > { %v635_v60 = vadd.f32 %v614_v59, %v595_v41  ;;  %v454_v41 = vsel %vm453_vm2, %v452_v55, %v436_v18  ;;  %v2914_v55 = vmax.f32 %v2399_v34, 0.0 }
 0x116   : > { %v2566_v54 = vpop.permute.xlu0 %979 }
 0x117   : > { %v651_v57 = vrot.slane %v635_v60, 6 }
 0x118   : > { %v419_v49 = vpop.permute.xlu1 %418 }
 0x119   : > { %v439_v22 = vadd.f32 %v419_v49, %v399_v51 }
 0x11a   : > { %v417_v26 = vpop.permute.xlu0 %416 }
 0x11b   : > { %v438_v16 = vadd.f32 %v417_v26, %v398_v56  ;;  %v633_v56 = vadd.f32 %v610_v53, %v2913_v52  ;;  %v458_v62 = vrot.slane %v439_v22, 5  ;;  %v2916_v26 = vmax.f32 %v2417_v50, 0.0  ;;  %v2613_v53 = vld [vmem:[%s2883_s2] sm:$0xf] }
 0x11c   : > { %v616_v13 = vpop.permute.xlu1 %615 }
 0x11d   : > { %v455_v48 = vrot.slane %v438_v16, 6  ;;  %v636_v47 = vadd.f32 %v616_v13, %v596_v61  ;;  %v650_v24 = vsel %vm453_vm2, %v649_v11, %v633_v56 }
 0x11e   : > { %v421_v30 = vpop.permute.xlu0 %420  ;;  %v652_v60 = vsel %vm456_vm3, %v651_v57, %v650_v24  ;;  %v2920_v57 = vmax.f32 %v2473_v20, 0.0 }
 0x11f   : > { %v440_v27 = vadd.f32 %v421_v30, %v400_v2  ;;  %v457_v61 = vsel %vm456_vm3, %v455_v48, %v454_v41  ;;  %v2915_v48 = vmax.f32 %v2408_v40, 0.0  ;;  %v2918_v41 = vmax.f32 %v2428_v63, 0.0 }
 0x120   : > { %v618_v7 = vpop.permute.xlu1 %617  ;;  %v460_v19 = vsel %vm459_vm4, %v458_v62, %v457_v61  ;;  %v2921_v62 = vmax.f32 %v2270_v28, 0.0 }
 0x121   : > { %v637_v32 = vadd.f32 %v618_v7, %v597_v10  ;;  %v461_v2 = vrot.slane %v440_v27, 4  ;;  %v653_v10 = vrot.slane %v636_v47, 5 }
 0x122   : > { %v423_v5 = vpop.permute.xlu0 %422 }
 0x123   : > { %v441_v23 = vadd.f32 %v423_v5, %v401_v21  ;;  %v655_v5 = vrot.slane %v637_v32, 4  ;;  %v463_v16 = vsel %vm462_vm5, %v461_v2, %v460_v19  ;;  %v654_v13 = vsel %vm459_vm4, %v653_v10, %v652_v60 }
 0x124   : > { %v620_v9 = vpop.permute.xlu1 %619  ;;  %v818_v10 = vadd.f32 %v2564_v44, %v2921_v62  ;;  %v2924_v19 = vmax.f32 %v2500_v6, 0.0  ;;  %v2118_v62 = vmov 0.0|0.0  }
 0x125   : > { %v638_v17 = vadd.f32 %v620_v9, %v598_v3  ;;  %v464_v21 = vrot.slane %v441_v23, 3  ;;  %v656_v15 = vsel %vm462_vm5, %v655_v5, %v654_v13  ;;  %v2917_v23 = vmov 0.0  }
 0x126   : > { %v425_v33 = vpop.permute.xlu0 %424  ;;  %v2923_v5 = vmax.f32 %v2482_v45, 0.0  ;;  %v2926_v45 = vmax.f32 %v2521_v36, 0.0  ;;  %v2927_v13 = vmax.f32 %v2455_v43, 0.0 }
 0x127   : > { %v442_v51 = vadd.f32 %v425_v33, %v2912_v42  ;;  %v657_v9 = vrot.slane %v638_v17, 3  ;;  %v466_v7 = vsel %vm465_vm6, %v464_v21, %v463_v16  ;;  %v2919_v17 = vmax.f32 %v2446_v31, 0.0 }
 0x128   : > { %v622_v4 = vpop.permute.xlu1 %621  ;;  %v2925_v16 = vmax.f32 %v2437_v14, 0.0 }
 0x129   : > { %v639_v8 = vadd.f32 %v622_v4, %v2914_v55  ;;  %v467_v12 = vrot.slane %v442_v51, 2  ;;  %v658_v18 = vsel %vm465_vm6, %v657_v9, %v656_v15  ;;  %v2922_v55 = vmax.f32 %v2464_v58, 0.0 }
 0x12a   : > { %v427_v3 = vpop.permute.xlu0 %426 }
 0x12b   : > { %v443_v27 = vadd.f32 %v427_v3, %v2915_v48  ;;  %v659_v30 = vrot.slane %v639_v8, 2  ;;  %v469_v40 = vsel %vm468_vm7, %v467_v12, %v466_v7 }
 0x12c   : > { %v624_v34 = vpop.permute.xlu1 %623 }
 0x12d   : > { %v470_v49 = vrot.slane %v443_v27, 1  ;;  %v640_v39 = vadd.f32 %v624_v34, %v2916_v26  ;;  %v660_v22 = vsel %vm468_vm7, %v659_v30, %v658_v18 }
 0x12e   : > { %v797_v29 = vpop.permute.xlu0 %796 }
 0x12f   : > { %v661_v46 = vrot.slane %v640_v39, 1  ;;  %v472_v59 = vsel %vm471_vm8, %v470_v49, %v469_v40  ;;  %v819_v11 = vadd.f32 %v797_v29, %v2918_v41  ;;  %v2928_v39 = vmax.f32 %v2491_v1, 0.0 }
 0x130   : > { %v982_v50 = vpop.permute.xlu1 %981  ;;  %1828 = vmatpush3.msra.mxu0 %v472_v59  ;;  %v2929_v40 = vmax.f32 %v2513_v25, 0.0  ;;  %v2930_v59 = vmax.f32 %v2530_v37, 0.0 }
 0x131   : > { %v662_v47 = vsel %vm471_vm8, %v661_v46, %v660_v22  ;;  %1830 = vmatmul.mubr.msk.f32.vlgmr.msra.gmra.mrb[0].mxu0 %vm474_vm9, %v2613_v53  ;;  %1837 = vmatprep.subr.mxu0 %v2917_v23  ;;  %v834_v56 = vrot.slane %v819_v11, 7  ;;  %v1004_v30 = vadd.f32 %v982_v50, %v2925_v16  ;;  %v2931_v22 = vmax.f32 %v2294_v38, 0.0 }
 0x132   : > { %1833 = vmatpush3.msra.mxu1 %v662_v47  ;;  %v799_v32 = vpop.permute.xlu0 %798  ;;  %1839 = vmatprep.mubr.msk.f32.mxu0 %vm2117_vm0, %v2917_v23 }
 0x133   : > { %1835 = vmatmul.mubr.msk.f32.vlgmr.msra.gmra.mrb[0].mxu1 %vm474_vm9, %v2613_v53  ;;  %1842 = vmatprep.subr.mxu1 %v2917_v23  ;;  %v820_v42 = vadd.f32 %v799_v32, %v2919_v17  ;;  %v835_v31 = vsel %vm453_vm2, %v834_v56, %v818_v10  ;;  %v1019_v14 = vrot.slane %v1004_v30, 7  ;;  %v1003_v1 = vadd.f32 %v2566_v54, %v2931_v22  ;;  %v735_v30 = vld [vmem:[#allocation2 + $0x5] sm:$0x1] }
 0x134   : > { %v984_v33 = vpop.permute.xlu1 %983  ;;  %1844 = vmatprep.mubr.msk.f32.mxu1 %vm2117_vm0, %v2917_v23  ;;  %v2932_v32 = vmax.f32 %v2543_v35, 0.0 }
 0x135   : > { %v836_v2 = vrot.slane %v820_v42, 6  ;;  %v1005_v49 = vadd.f32 %v984_v33, %v2927_v13  ;;  %v1020_v37 = vsel %vm453_vm2, %v1019_v14, %v1003_v1  ;;  %v2933_v42 = vmax.f32 %v2551_v0, 0.0  ;;  %v1127_v0 = vld [vmem:[%s2884_s3] sm:$0xff] }
 0x136   : > { %v803_v51 = vpop.permute.xlu0 %802 }
 0x137   : > { %v822_v63 = vadd.f32 %v803_v51, %v2922_v55  ;;  %v837_v3 = vsel %vm456_vm3, %v836_v2, %v835_v31  ;;  %v1021_v43 = vrot.slane %v1005_v49, 6  ;;  %v1128_v2 = vld [vmem:[%s2884_s3 + $0x8] sm:$0xff]  ;;  %v1131_v55 = vld [vmem:[%s2884_s3 + $0x20] sm:$0xff]  ;;  %v1133_v31 = vld [vmem:[%s2884_s3 + $0x30] sm:$0xff] }
 0x138   : > { %v801_v52 = vpop.permute.xlu1 %800  ;;  %v2695_v10 = vpack.c.bf16 %v1128_v2, %v1127_v0  ;;  %v736_v49 = vld [vmem:[#allocation2 + $0x9] sm:$0x1]  ;;  %v922_v0 = vld [vmem:[#allocation2 + $0xe] sm:$0x1] }
 0x139   : > { %v821_v61 = vadd.f32 %v801_v52, %v2920_v57  ;;  %v840_v9 = vrot.slane %v822_v63, 4  ;;  %v1022_v11 = vsel %vm456_vm3, %v1021_v43, %v1020_v37  ;;  %v1132_v63 = vld [vmem:[%s2884_s3 + $0x28] sm:$0xff] }
 0x13a   : > { %v805_v4 = vpop.permute.xlu0 %804 }
 0x13b   : > { %v838_v21 = vrot.slane %v821_v61, 5  ;;  %v823_v12 = vadd.f32 %v805_v4, %v2923_v5  ;;  %v1129_v4 = vld [vmem:[%s2884_s3 + $0x10] sm:$0xff]  ;;  %v1134_v5 = vld [vmem:[%s2884_s3 + $0x38] sm:$0xff] }
 0x13c   : > { %v986_v8 = vpop.permute.xlu1 %985 }
 0x13d   : > { %v839_v24 = vsel %vm459_vm4, %v838_v21, %v837_v3  ;;  %v842_v48 = vrot.slane %v823_v12, 3  ;;  %v1006_v7 = vadd.f32 %v986_v8, %v2928_v39  ;;  %v2715_v8 = vpack.c.bf16 %v1132_v63, %v1131_v55  ;;  %v548_v3 = vld [vmem:[#allocation2] sm:$0x1] }
 0x13e   : > { %v807_v20 = vpop.permute.xlu0 %806  ;;  %v841_v58 = vsel %vm462_vm5, %v840_v9, %v839_v24  ;;  %v2727_v12 = vpack.c.bf16 %v1134_v5, %v1133_v31  ;;  %v1105_v5 = vld [vmem:[#allocation2 + $0x7] sm:$0x1] }
 0x13f   : > { %v824_v28 = vadd.f32 %v807_v20, %v2924_v19  ;;  %v843_v6 = vsel %vm465_vm6, %v842_v48, %v841_v58  ;;  %v1023_v47 = vrot.slane %v1006_v7, 5  ;;  %v549_v20 = vld [vmem:[#allocation2 + $0x4] sm:$0x1]  ;;  %v550_v19 = vld [vmem:[#allocation2 + $0x8] sm:$0x1] }
 0x140   : > { %v988_v44 = vpop.permute.xlu1 %987 }
 0x141   : > { %v844_v27 = vrot.slane %v824_v28, 2  ;;  %v1007_v46 = vadd.f32 %v988_v44, %v2929_v40  ;;  %v1024_v54 = vsel %vm459_vm4, %v1023_v47, %v1022_v11  ;;  %v551_v28 = vld [vmem:[#allocation2 + $0xc] sm:$0x1] }
 0x142   : > { %v809_v60 = vpop.permute.xlu0 %808 }
 0x143   : > { %v825_v34 = vadd.f32 %v809_v60, %v2926_v45  ;;  %v845_v29 = vsel %vm468_vm7, %v844_v27, %v843_v6  ;;  %v1025_v25 = vrot.slane %v1007_v46, 4  ;;  %v734_v27 = vld [vmem:[#allocation2 + $0x1] sm:$0x1] }
 0x144   : > { %v990_v26 = vpop.permute.xlu1 %989 }
 0x145   : > { %v846_v15 = vrot.slane %v825_v34, 1  ;;  %v1008_v36 = vadd.f32 %v990_v26, %v2930_v59  ;;  %v1026_v51 = vsel %vm462_vm5, %v1025_v25, %v1024_v54  ;;  %v737_v26 = vld [vmem:[#allocation2 + $0xd] sm:$0x1] }
 0x147   : > { %v847_v18 = vsel %vm471_vm8, %v846_v15, %v845_v29  ;;  %v1027_v41 = vrot.slane %v1008_v36, 3 }
 0x148   : > { %v992_v50 = vpop.permute.xlu1 %991  ;;  %1838 = vmatpush3.msra.mxu0 %v847_v18 }
 0x149   : > { %v1009_v33 = vadd.f32 %v992_v50, %v2932_v32  ;;  %1840 = vmatmul.mubr.msk.f32.vlgmr.msra.gmra.mrb[2].mxu0 %vm474_vm9, %v2613_v53  ;;  %v1028_v52 = vsel %vm465_vm6, %v1027_v41, %v1026_v51  ;;  %1923 = vmatprep.subr.bf16.mxu0 %v2118_v62 }
 0x14a   : > { %1863 = vmatprep.mubr.msk.f32.mxu0 %vm2117_vm0, %v2917_v23  ;;  %1925 = vmatpush3.bf16.msra.mxu0 %v2695_v10 }
 0x14b   : > { %v1029_v17 = vrot.slane %v1009_v33, 2  ;;  %1926 = vmatprep.subr.bf16.mxu0 %v2118_v62 }
 0x14c   : > { %v994_v38 = vpop.permute.xlu1 %993 }
 0x14d   : > { %v1010_v35 = vadd.f32 %v994_v38, %v2933_v42  ;;  %v1030_v57 = vsel %vm468_vm7, %v1029_v17, %v1028_v52  ;;  %v919_v52 = vld [vmem:[#allocation2 + $0x2] sm:$0x1] }
 0x14f   : > { %v1031_v56 = vrot.slane %v1010_v35, 1 }
 0x151   : > { %v1032_v61 = vsel %vm471_vm8, %v1031_v56, %v1030_v57  ;;  %v920_v56 = vld [vmem:[#allocation2 + $0x6] sm:$0x1] }
 0x152   : > { %1843 = vmatpush3.msra.mxu1 %v1032_v61  ;;  %v921_v61 = vld [vmem:[#allocation2 + $0xa] sm:$0x1] }
 0x153   : > { %1845 = vmatmul.mubr.msk.f32.vlgmr.msra.gmra.mrb[2].mxu1 %vm474_vm9, %v2613_v53  ;;  %1935 = vmatprep.subr.bf16.mxu1 %v2118_v62  ;;  %v1130_v53 = vld [vmem:[%s2884_s3 + $0x18] sm:$0xff] }
 0x154   : > { %1882 = vmatprep.mubr.msk.f32.mxu1 %vm2117_vm0, %v2917_v23  ;;  %1937 = vmatpush3.bf16.msra.mxu1 %v2695_v10  ;;  %v2703_v21 = vpack.c.bf16 %v1130_v53, %v1129_v4 }
 0x155   : > { %1938 = vmatprep.subr.bf16.mxu1 %v2118_v62 }
 0x156   : > { %1928 = vmatpush3.bf16.msra.mxu0 %v2703_v21 }
 0x157   : > { %1929 = vmatprep.subr.bf16.mxu0 %v2118_v62 }
 0x158   : > { %1940 = vmatpush3.bf16.msra.mxu1 %v2703_v21 }
 0x159   : > { %1941 = vmatprep.subr.bf16.mxu1 %v2118_v62 }
 0x15a   : > { %1931 = vmatpush3.bf16.msra.mxu0 %v2715_v8 }
 0x15b   : > { %1932 = vmatprep.subr.bf16.mxu0 %v2118_v62 }
 0x15c   : > { %1943 = vmatpush3.bf16.msra.mxu1 %v2715_v8 }
 0x15d   : > { %1944 = vmatprep.subr.bf16.mxu1 %v2118_v62 }
 0x15e   : > { %1934 = vmatpush3.bf16.msra.mxu0 %v2727_v12 }
 0x15f   : > { %1947 = vmatprep.subr.bf16.mxu0 %v2118_v62 }
 0x160   : > { %1946 = vmatpush3.bf16.msra.mxu1 %v2727_v12 }
 0x161   : > { %1959 = vmatprep.subr.bf16.mxu1 %v2118_v62 }
 0x204   : > { %v544_v24 = vpop.f32.mrb[0].mxu0 }
 0x205   : > { %v553_v9 = vrot.slane %v544_v24, 1  ;;  %v554_v44 = vrot.slane %v544_v24, 2  ;;  %v555_v48 = vrot.slane %v544_v24, 3  ;;  %v560_v58 = vadd.f32 %v548_v3, %v544_v24  ;;  %v1831_v60 = vpop.f32.mrb[1].mxu0  ;;  %v1107_v24 = vld [vmem:[#allocation2 + $0xf] sm:$0x1] }
 0x206   : > { %v730_v16 = vpop.f32.mrb[0].mxu1 }
 0x207   : > { %v561_v45 = vadd.f32 %v553_v9, %v549_v20  ;;  %v562_v34 = vadd.f32 %v554_v44, %v550_v19  ;;  %v563_v13 = vadd.f32 %v555_v48, %v551_v28  ;;  %565 = vst.msk [vmem:[#allocation2] sm:$0x1] %vm564_vm10, %v560_v58  ;;  %v739_v6 = vrot.slane %v730_v16, 1  ;;  %v1836_v39 = vpop.f32.mrb[1].mxu1  ;;  %v1106_v20 = vld [vmem:[#allocation2 + $0xb] sm:$0x1] }
 0x208   : > { %v740_v7 = vrot.slane %v730_v16, 2  ;;  %v741_v15 = vrot.slane %v730_v16, 3  ;;  %v746_v29 = vadd.f32 %v734_v27, %v730_v16 }
 0x209   : > { %566 = vst.msk [vmem:[#allocation2 + $0x4] sm:$0x1] %vm564_vm10, %v561_v45  ;;  %567 = vst.msk [vmem:[#allocation2 + $0x8] sm:$0x1] %vm564_vm10, %v562_v34  ;;  %v747_v40 = vadd.f32 %v739_v6, %v735_v30 }
 0x20a   : > { %568 = vst.msk [vmem:[#allocation2 + $0xc] sm:$0x1] %vm564_vm10, %v563_v13  ;;  %v748_v46 = vadd.f32 %v740_v7, %v736_v49  ;;  %v749_v14 = vadd.f32 %v741_v15, %v737_v26  ;;  %750 = vst.msk [vmem:[#allocation2 + $0x1] sm:$0x1] %vm564_vm10, %v746_v29 }
 0x20b   : > { %751 = vst.msk [vmem:[#allocation2 + $0x5] sm:$0x1] %vm564_vm10, %v747_v40 }
 0x20c   : > { %752 = vst.msk [vmem:[#allocation2 + $0x9] sm:$0x1] %vm564_vm10, %v748_v46  ;;  %753 = vst.msk [vmem:[#allocation2 + $0xd] sm:$0x1] %vm564_vm10, %v749_v14 }
 0x20e   : > { %v1135_v59 = vld [vmem:[#allocation2] sm:$0x1] }
 0x210   : > { %v1136_v36 = vld [vmem:[#allocation2 + $0x4] sm:$0x1]  ;;  %v1137_v18 = vld [vmem:[#allocation2 + $0x8] sm:$0x1] }
 0x211   : > { %v1138_v43 = vld [vmem:[#allocation2 + $0xc] sm:$0x1]  ;;  %v1143_v50 = vrot.slane %v1136_v36, 7  ;;  %v1145_v22 = vrot.slane %v1137_v18, 6  ;;  %v1256_v47 = vld [vmem:[#allocation2 + $0x1] sm:$0x1] }
 0x212   : > { %v1147_v1 = vrot.slane %v1138_v43, 5  ;;  %v1257_v32 = vld [vmem:[#allocation2 + $0x5] sm:$0x1]  ;;  %v2119_v18 = vmov 1966171168  }
 0x213   : > { %v1144_v33 = vsel %vm453_vm2, %v1143_v50, %v1135_v59  ;;  %v1258_v25 = vld [vmem:[#allocation2 + $0x9] sm:$0x1]  ;;  %v1259_v37 = vld [vmem:[#allocation2 + $0xd] sm:$0x1]  ;;  %v1264_v41 = vrot.slane %v1257_v32, 7  ;;  %v1224_v43 = vunpack.c.l.s4 %v2119_v18  ;;  %v1226_v50 = vlaneseq }
 0x214   : > { %v1146_v11 = vsel %vm456_vm3, %v1145_v22, %v1144_v33  ;;  %v1266_v17 = vrot.slane %v1258_v25, 6  ;;  %v1268_v38 = vrot.slane %v1259_v37, 5 }
 0x215   : > { %v1148_v54 = vsel %vm459_vm4, %v1147_v1, %v1146_v11  ;;  %v1265_v42 = vsel %vm453_vm2, %v1264_v41, %v1256_v47  ;;  %v1225_v22 = vunpack.c.0.s8 %v1224_v43  ;;  %v1227_v1 = vshrl.u32 %v1226_v50, 7 }
 0x216   : > { %1864 = vmatmul.mubr.msk.f32.vlgmr.msra.gmra.mrb[4].mxu0 %vm1149_vm11, %v1148_v54  ;;  %v1267_v35 = vsel %vm456_vm3, %v1266_v17, %v1265_v42 }
 0x217   : > { %v1269_v51 = vsel %vm459_vm4, %v1268_v38, %v1267_v35  ;;  %1949 = vmatpush3.bf16.msra.mxu0 %v2695_v10  ;;  %1901 = vmatprep.mubr.msk.f32.mxu0 %vm2117_vm0, %v2917_v23  ;;  %v1228_v47 = vsub.s32 %v1225_v22, %v1227_v1 }
 0x218   : > { %1883 = vmatmul.mubr.msk.f32.vlgmr.msra.gmra.mrb[4].mxu1 %vm1149_vm11, %v1269_v51  ;;  %1950 = vmatprep.subr.bf16.mxu0 %v2118_v62 }
 0x219   : > { %1961 = vmatpush3.bf16.msra.mxu1 %v2695_v10  ;;  %1920 = vmatprep.mubr.msk.f32.mxu1 %vm2117_vm0, %v2917_v23 }
 0x21a   : > { %1962 = vmatprep.subr.bf16.mxu1 %v2118_v62 }
 0x21b   : > { %1952 = vmatpush3.bf16.msra.mxu0 %v2703_v21 }
 0x21c   : > { %v915_v57 = vpop.f32.mrb[2].mxu0  ;;  %1953 = vmatprep.subr.bf16.mxu0 %v2118_v62 }
 0x21d   : > { %v924_v2 = vrot.slane %v915_v57, 1  ;;  %v925_v4 = vrot.slane %v915_v57, 2  ;;  %v926_v53 = vrot.slane %v915_v57, 3  ;;  %v931_v55 = vadd.f32 %v919_v52, %v915_v57  ;;  %v1841_v63 = vpop.f32.mrb[3].mxu0  ;;  %1964 = vmatpush3.bf16.msra.mxu1 %v2703_v21  ;;  %v1104_v21 = vld [vmem:[#allocation2 + $0x3] sm:$0x1] }
 0x21e   : > { %1965 = vmatprep.subr.bf16.mxu1 %v2118_v62 }
 0x21f   : > { %v932_v23 = vadd.f32 %v924_v2, %v920_v56  ;;  %v933_v10 = vadd.f32 %v925_v4, %v921_v61  ;;  %v934_v31 = vadd.f32 %v926_v53, %v922_v0  ;;  %935 = vst.msk [vmem:[#allocation2 + $0x2] sm:$0x1] %vm564_vm10, %v931_v55  ;;  %1955 = vmatpush3.bf16.msra.mxu0 %v2715_v8 }
 0x220   : > { %1956 = vmatprep.subr.bf16.mxu0 %v2118_v62 }
 0x221   : > { %936 = vst.msk [vmem:[#allocation2 + $0x6] sm:$0x1] %vm564_vm10, %v932_v23  ;;  %937 = vst.msk [vmem:[#allocation2 + $0xa] sm:$0x1] %vm564_vm10, %v933_v10  ;;  %1967 = vmatpush3.bf16.msra.mxu1 %v2715_v8 }
 0x222   : > { %938 = vst.msk [vmem:[#allocation2 + $0xe] sm:$0x1] %vm564_vm10, %v934_v31  ;;  %1968 = vmatprep.subr.bf16.mxu1 %v2118_v62 }
 0x223   : > { %1958 = vmatpush3.bf16.msra.mxu0 %v2727_v12 }
 0x225   : > { %1970 = vmatpush3.bf16.msra.mxu1 %v2727_v12 }
 0x226   : > { %v1100_v3 = vpop.f32.mrb[2].mxu1  ;;  %v1375_v58 = vld [vmem:[#allocation2 + $0x2] sm:$0x1] }
 0x227   : > { %v1109_v19 = vrot.slane %v1100_v3, 1  ;;  %v1110_v28 = vrot.slane %v1100_v3, 2  ;;  %v1111_v9 = vrot.slane %v1100_v3, 3  ;;  %v1116_v44 = vadd.f32 %v1104_v21, %v1100_v3  ;;  %v1846_v48 = vpop.f32.mrb[3].mxu1 }
 0x228   : > { %v1376_v27 = vld [vmem:[#allocation2 + $0x6] sm:$0x1]  ;;  %v1377_v60 = vld [vmem:[#allocation2 + $0xa] sm:$0x1] }
 0x229   : > { %v1378_v8 = vld [vmem:[#allocation2 + $0xe] sm:$0x1]  ;;  %v1117_v16 = vadd.f32 %v1109_v19, %v1105_v5  ;;  %v1118_v62 = vadd.f32 %v1110_v28, %v1106_v20  ;;  %v1119_v30 = vadd.f32 %v1111_v9, %v1107_v24  ;;  %1120 = vst.msk [vmem:[#allocation2 + $0x3] sm:$0x1] %vm564_vm10, %v1116_v44  ;;  %v1383_v45 = vrot.slane %v1376_v27, 7 }
 0x22a   : > { %v1385_v34 = vrot.slane %v1377_v60, 6  ;;  %v1387_v12 = vrot.slane %v1378_v8, 5 }
 0x22b   : > { %1121 = vst.msk [vmem:[#allocation2 + $0x7] sm:$0x1] %vm564_vm10, %v1117_v16  ;;  %1122 = vst.msk [vmem:[#allocation2 + $0xb] sm:$0x1] %vm564_vm10, %v1118_v62  ;;  %v1384_v13 = vsel %vm453_vm2, %v1383_v45, %v1375_v58 }
 0x22c   : > { %1123 = vst.msk [vmem:[#allocation2 + $0xf] sm:$0x1] %vm564_vm10, %v1119_v30  ;;  %v1386_v49 = vsel %vm456_vm3, %v1385_v34, %v1384_v13 }
 0x22d   : > { %v1388_v26 = vsel %vm459_vm4, %v1387_v12, %v1386_v49 }
 0x22e   : > { %1902 = vmatmul.mubr.msk.f32.vlgmr.msra.gmra.mrb[6].mxu0 %vm1149_vm11, %v1388_v26 }
 0x230   : > { %v1494_v40 = vld [vmem:[#allocation2 + $0x3] sm:$0x1] }
 0x232   : > { %v1495_v6 = vld [vmem:[#allocation2 + $0x7] sm:$0x1]  ;;  %v1496_v39 = vld [vmem:[#allocation2 + $0xb] sm:$0x1] }
 0x233   : > { %v1497_v7 = vld [vmem:[#allocation2 + $0xf] sm:$0x1]  ;;  %v1502_v15 = vrot.slane %v1495_v6, 7  ;;  %v1504_v29 = vrot.slane %v1496_v39, 6 }
 0x234   : > { %v1506_v14 = vrot.slane %v1497_v7, 5 }
 0x235   : > { %v1503_v46 = vsel %vm453_vm2, %v1502_v15, %v1494_v40 }
 0x236   : > { %v1505_v59 = vsel %vm456_vm3, %v1504_v29, %v1503_v46 }
 0x237   : > { %v1507_v36 = vsel %vm459_vm4, %v1506_v14, %v1505_v59 }
 0x238   : > { %1921 = vmatmul.mubr.msk.f32.vlgmr.msra.gmra.mrb[6].mxu1 %vm1149_vm11, %v1507_v36 }
 0x2e9   : > { %v1218_v32 = vpop.f32.mrb[4].mxu0 }
 0x2ea   : > { %v1229_v33 = vrot.slane %v1218_v32, %v1228_v47  ;;  %v1865_v25 = vpop.f32.mrb[5].mxu0 }
 0x2eb   : > { %v1338_v37 = vpop.f32.mrb[4].mxu1 }
 0x2ec   : > { %v1230_v41 = vcombine.high %v1229_v33, %v1229_v33  ;;  %v1237_v11 = vrot.slane %v1229_v33, %v1228_v47  ;;  %v1349_v17 = vrot.slane %v1338_v37, %v1228_v47  ;;  %v1884_v38 = vpop.f32.mrb[5].mxu1 }
 0x2ee   : > { %v1244_v54 = vrot.slane %v1230_v41, %v1228_v47  ;;  %v1245_v42 = vcombine.high %v1237_v11, %v1237_v11  ;;  %1252 = vst.msk [vmem:[%s2788_s8] sm:$0x1] %vm1251_vm12, %v1237_v11  ;;  %v1350_v35 = vcombine.high %v1349_v17, %v1349_v17  ;;  %v1357_v51 = vrot.slane %v1349_v17, %v1228_v47 }
 0x2f0   : > { %v1246_v52 = vcombine.high %v1244_v54, %v1244_v54  ;;  %1253 = vst.msk [vmem:[%s2788_s8 + $0x4] sm:$0x1] %vm1251_vm12, %v1244_v54  ;;  %1254 = vst.msk [vmem:[%s2788_s8 + $0x8] sm:$0x1] %vm1251_vm12, %v1245_v42  ;;  %v1364_v56 = vrot.slane %v1350_v35, %v1228_v47  ;;  %v1365_v57 = vcombine.high %v1357_v51, %v1357_v51 }
 0x2f1   : > { %1371 = vst.msk [vmem:[%s2788_s8 + $0x1] sm:$0x1] %vm1251_vm12, %v1357_v51 }
 0x2f2   : > { %1255 = vst.msk [vmem:[%s2788_s8 + $0xc] sm:$0x1] %vm1251_vm12, %v1246_v52  ;;  %v1366_v61 = vcombine.high %v1364_v56, %v1364_v56  ;;  %1372 = vst.msk [vmem:[%s2788_s8 + $0x5] sm:$0x1] %vm1251_vm12, %v1364_v56 }
 0x2f3   : > { %1373 = vst.msk [vmem:[%s2788_s8 + $0x9] sm:$0x1] %vm1251_vm12, %v1365_v57 }
 0x2f4   : > { %1374 = vst.msk [vmem:[%s2788_s8 + $0xd] sm:$0x1] %vm1251_vm12, %v1366_v61 }
 0x301   : > { %v1457_v0 = vpop.f32.mrb[6].mxu0 }
 0x302   : > { %v1468_v2 = vrot.slane %v1457_v0, %v1228_v47  ;;  %v1903_v4 = vpop.f32.mrb[7].mxu0 }
 0x304   : > { %v1469_v53 = vcombine.high %v1468_v2, %v1468_v2  ;;  %v1476_v55 = vrot.slane %v1468_v2, %v1228_v47 }
 0x306   : > { %v1483_v63 = vrot.slane %v1469_v53, %v1228_v47  ;;  %v1484_v23 = vcombine.high %v1476_v55, %v1476_v55  ;;  %1490 = vst.msk [vmem:[%s2788_s8 + $0x2] sm:$0x1] %vm1251_vm12, %v1476_v55 }
 0x308   : > { %v1485_v10 = vcombine.high %v1483_v63, %v1483_v63  ;;  %1491 = vst.msk [vmem:[%s2788_s8 + $0x6] sm:$0x1] %vm1251_vm12, %v1483_v63  ;;  %1492 = vst.msk [vmem:[%s2788_s8 + $0xa] sm:$0x1] %vm1251_vm12, %v1484_v23 }
 0x30a   : > { %1493 = vst.msk [vmem:[%s2788_s8 + $0xe] sm:$0x1] %vm1251_vm12, %v1485_v10 }
 0x30b   : > { %v1576_v31 = vpop.f32.mrb[6].mxu1 }
 0x30c   : > { %v1587_v21 = vrot.slane %v1576_v31, %v1228_v47  ;;  %v1922_v5 = vpop.f32.mrb[7].mxu1 }
 0x30e   : > { %v1588_v3 = vcombine.high %v1587_v21, %v1587_v21  ;;  %v1595_v20 = vrot.slane %v1587_v21, %v1228_v47 }
 0x310   : > { %v1602_v24 = vrot.slane %v1588_v3, %v1228_v47  ;;  %v1603_v19 = vcombine.high %v1595_v20, %v1595_v20  ;;  %1609 = vst.msk [vmem:[%s2788_s8 + $0x3] sm:$0x1] %vm1251_vm12, %v1595_v20 }
 0x312   : > { %v1604_v28 = vcombine.high %v1602_v24, %v1602_v24  ;;  %1610 = vst.msk [vmem:[%s2788_s8 + $0x7] sm:$0x1] %vm1251_vm12, %v1602_v24  ;;  %1611 = vst.msk [vmem:[%s2788_s8 + $0xb] sm:$0x1] %vm1251_vm12, %v1603_v19 }
 0x314   : > { %1612 = vst.msk [vmem:[%s2788_s8 + $0xf] sm:$0x1] %vm1251_vm12, %v1604_v28 }
 0x315   : > { %2047 = shalt.err (!%p2044_p5)
}
 0x316   : > { %s2048_s25 = scalar_lea.hbm %s2821_s13, 256  ;;  %s2052_s7 = scalar_lea.hbm %s2886_s5, 512 }
 0x317   : > { %p2049_p6 = scmp.ne.s32.totalorder %s2821_s13, %s2048_s25  ;;  %p2053_p10 = scmp.lt.u32.totalorder %s2821_s13, %s2886_s5 }
 0x318   : > { %p2054_p11 = scmp.lt.u32.totalorder %s2052_s7, %s2048_s25  ;;  %p2056_p13 = scmp.lt.u32.totalorder %s2048_s25, %s2821_s13 }
 0x319   : > { %p2050_p7 = pnand %p2049_p6, %p2192_p4 }
 0x31a   : > { %p2055_p12 = por %p2054_p11, %p2053_p10 }
 0x31b   : > { %p2051_p9 = pneg %p2050_p7 }
 0x31c   : > { %p2057_p0 = por %p2056_p13, %p2055_p12 }
 0x31e   : > { %p2058_p1 = pnand %p2057_p0, %p2051_p9 }
 0x320   : > { %2061 = shalt.err (!%p2058_p1)
}
 0x321   : > { %s2121_s11 = smov 4  }
 0x322   : > { %1971 = dma.vmem_to_hbm [thread:$0]  (%p2192_p4), %s2827_s10, 256, %s2821_s13, %s2833_s21, %s2115_s16, %s2115_s16, %s2121_s11  }
 0x323 PF: > { %p1977_p2 = scmp.ge.s32.totalorder %s2112_s23, 2  ;;  %s1643_s12 = sand.u32 1, %s2092_s18  }
 0x324   : > { %s1644_s14 = scalar_lea.sflag [#allocation4], %s1643_s12 }
 0x325   : > { %p1974_p3 = pnand %p1977_p2, %p2199_p8 }
 0x327   : > { %2087 = dma.done.wait (!%p1974_p3), %s1644_s14, 256  }
 0x328   : > { %2089 = vsyncadd (!%p1974_p3), %s1644_s14, 4294967040  ;;  %s18_s23 = sadd.s32 1, %s2112_s23   ;;  %s2934_s18 = smov %s2096_s19 }
 0x329   : > { %p15_p5 = scmp.ge.s32.totalorder %s18_s23, 4   ;;  %s2935_s19 = smov %s2100_s20 }
 0x32a   : > { %s2936_s20 = smov %s2205_s6  ;;  %s2937_s21 = smov %s2108_s22 }
 0x32b   : > { %s2938_s22 = smov %s2940_s26  ;;  %17 = sbr.rel (!%p15_p5) target bundleno = 4 (0x4), region = 92 }
 0x332   :  { %1649 = vsyncpa [#allocation4], 1 }
 0x333   :  { %1651 = vsyncpa [#allocation4 + $0x1], 1 }

</bundles_post_ra>
